<compile_context>
chip_gen: v7x
topology: tpu7x:2x2x1
jax: 0.10.0
libtpu: 0.0.40
codegen_flags: <defaults>
</compile_context>

<pallas_src>
import math

import jax
import jax.numpy as jnp
from jax.experimental import pallas as pl
from jax.experimental.pallas import tpu as pltpu


def se_block_kernel(x_ref, w1t_ref, b1_ref, w2t_ref, b2_ref, o_ref):
    x = x_ref[...]                                         # (TM, C), input dtype
    xm = x.astype(w1t_ref.dtype)                           # bf16 operand for the MXU
    h = jnp.dot(xm, w1t_ref[...], preferred_element_type=jnp.float32)
    h = jnp.maximum(h + b1_ref[...], 0.0)                  # ReLU, f32   (TM, Hd)
    g = jnp.dot(h.astype(w2t_ref.dtype), w2t_ref[...],
                preferred_element_type=jnp.float32)
    z = g + b2_ref[...]                                    # f32         (TM, C)
    gate = pl.reciprocal(1.0 + jnp.exp(-z), approx=True)   # sigmoid: EUP exp + approx recip
    o_ref[...] = (x * gate.astype(x.dtype)).astype(o_ref.dtype)


def _choose_tm(M, C, dsize, target_bytes=2 << 20, max_rows=4096):
    """Row tile: multiple of 8, ~target_bytes per streamed buffer, >=2 grid steps."""
    rows = max(8, min(max_rows, target_bytes // max(1, C * dsize)))
    tm = max(8, (rows // 8) * 8)
    if M > 8:
        # Keep at least 2 grid steps so both v7x TensorCores get work.
        half = -(-M // 2)
        tm = min(tm, ((half + 7) // 8) * 8)
    m8 = ((M + 7) // 8) * 8
    tm = min(tm, m8)
    if tm >= M:
        tm = M          # single full-extent block is always a legal block shape
    return tm


def _vmem_limit_bytes(tm, C, Hd, io_dsize):
    tile_io = 4 * tm * C * io_dsize          # double-buffered x + out windows
    weights = 2 * (2 * C * Hd) * 2           # bf16 weights, worst-case double-buffered
    biases = 2 * (C + Hd) * 4
    body = tm * Hd * 4 + 2 * tm * C * 4      # f32 intermediates headroom
    est = tile_io + weights + biases + body + (4 << 20)
    return int(min(max(est, 32 << 20), 64 << 20))


def se_block(x, w1, b1, w2, b2):
    """SEBlock forward.

    x : (..., C)            input (any leading dims)
    w1: (Hd, C), b1: (Hd,)  linear_1 (PyTorch layout: out_features, in_features)
    w2: (C, Hd), b2: (C,)   linear_2
    """
    orig_shape = x.shape
    C = orig_shape[-1]
    Hd = w1.shape[0]
    M = math.prod(orig_shape[:-1])

    x2 = x.reshape(M, C)                     # lane-dense: C on the 128-lane axis
    io_dsize = jnp.dtype(x.dtype).itemsize

    tm = _choose_tm(M, C, io_dsize)
    grid_m = pl.cdiv(M, tm)                  # boundary block masked on writeback
    vmem_limit = _vmem_limit_bytes(tm, C, Hd, io_dsize)

    # bf16 weights for the MXU (halves weight HBM/VMEM); f32 broadcast-row biases.
    w1t = w1.T.astype(jnp.bfloat16)          # (C, Hd)
    w2t = w2.T.astype(jnp.bfloat16)          # (Hd, C)
    b1r = b1.reshape(1, Hd).astype(jnp.float32)
    b2r = b2.reshape(1, C).astype(jnp.float32)

    cost = pl.CostEstimate(
        flops=4 * M * C * Hd,                        # two matmuls
        transcendentals=M * C,                       # sigmoid exp
        bytes_accessed=2 * M * C * io_dsize + 2 * (2 * C * Hd) + 4 * (C + Hd),
    )

    def run(single_buffer_weights):
        def const_spec(shape):
            # Grid-invariant operands: DMA'd once; request single buffering to
            # reclaim VMEM for the row tile.
            if single_buffer_weights:
                return pl.BlockSpec(shape, lambda i: (0, 0),
                                    pipeline_mode=pl.Buffered(buffer_count=1))
            return pl.BlockSpec(shape, lambda i: (0, 0))

        return pl.pallas_call(
            se_block_kernel,
            out_shape=jax.ShapeDtypeStruct((M, C), x.dtype),
            grid=(grid_m,),
            in_specs=[
                pl.BlockSpec((tm, C), lambda i: (i, 0)),
                const_spec((C, Hd)),
                const_spec((1, Hd)),
                const_spec((Hd, C)),
                const_spec((1, C)),
            ],
            out_specs=pl.BlockSpec((tm, C), lambda i: (i, 0)),
            compiler_params=pltpu.CompilerParams(
                dimension_semantics=("parallel",),
                vmem_limit_bytes=vmem_limit),
            cost_estimate=cost,
        )(x2, w1t, b1r, w2t, b2r)

    try:
        out = run(single_buffer_weights=True)
    except Exception:
        # Fallback if this Pallas build does not honor pipeline_mode on
        # pallas_call BlockSpecs: default double-buffered weights.
        out = run(single_buffer_weights=False)

    return out.reshape(orig_shape)


def se_block_reference(x, w1, b1, w2, b2):
    """Pure-JAX reference mirroring the PyTorch forward."""
    h = jax.nn.relu(jnp.einsum("...c,hc->...h", x, w1) + b1)
    g = jax.nn.sigmoid(jnp.einsum("...h,ch->...c", h, w2) + b2)
    return x * g


def init_params(key, in_ch, r=8):
    hd = in_ch // r
    k1, k2, k3, k4 = jax.random.split(key, 4)
    bound1 = 1.0 / math.sqrt(in_ch)
    bound2 = 1.0 / math.sqrt(hd)
    return {
        "w1": jax.random.uniform(k1, (hd, in_ch), jnp.float32, -bound1, bound1),
        "b1": jax.random.uniform(k2, (hd,), jnp.float32, -bound1, bound1),
        "w2": jax.random.uniform(k3, (in_ch, hd), jnp.float32, -bound2, bound2),
        "b2": jax.random.uniform(k4, (in_ch,), jnp.float32, -bound2, bound2),
    }


if __name__ == "__main__":
    key = jax.random.PRNGKey(0)
    k_x, k_p = jax.random.split(key)

    N, S, C = 2, 16, 32                       # in_ch=32, r=8 -> hidden=4
    x = jax.random.normal(k_x, (N, S, C), jnp.float32)
    p = init_params(k_p, in_ch=C, r=8)

    # f32 I/O path (matmuls run bf16 on the MXU -> relaxed tolerance).
    out = se_block(x, p["w1"], p["b1"], p["w2"], p["b2"])
    out = jax.block_until_ready(out)
    ref = se_block_reference(x, p["w1"], p["b1"], p["w2"], p["b2"])
    assert out.shape == x.shape
    assert jnp.allclose(out, ref, atol=3e-2, rtol=3e-2), "f32 mismatch vs reference"

    # bf16 I/O path (half the HBM traffic; compute accumulates in f32).
    x_bf16 = x.astype(jnp.bfloat16)
    out_bf16 = se_block(x_bf16, p["w1"], p["b1"], p["w2"], p["b2"])
    out_bf16 = jax.block_until_ready(out_bf16)
    ref_bf16 = se_block_reference(
        x_bf16.astype(jnp.float32), p["w1"], p["b1"], p["w2"], p["b2"])
    assert out_bf16.dtype == jnp.bfloat16
    assert jnp.allclose(out_bf16.astype(jnp.float32), ref_bf16,
                        atol=5e-2, rtol=5e-2), "bf16 mismatch vs reference"

    print("KERNEL_OK")
</pallas_src>

<mosaic_0001>
module attributes {stable_mosaic.version = 11 : i64} {
  func.func @se_block_kernel(%arg0: i32, %arg1: memref<16x32xf32, #tpu.memory_space<vmem>>, %arg2: memref<32x4xbf16, #tpu.memory_space<vmem>>, %arg3: memref<1x4xf32, #tpu.memory_space<vmem>>, %arg4: memref<4x32xbf16, #tpu.memory_space<vmem>>, %arg5: memref<1x32xf32, #tpu.memory_space<vmem>>, %arg6: memref<16x32xf32, #tpu.memory_space<vmem>>) attributes {dimension_semantics = [#tpu.dimension_semantics<parallel>], iteration_bounds = array<i64: 2>, scalar_prefetch = 0 : i64, scratch_operands = 0 : i64, tpu.core_type = #tpu.core_type<tc>, window_params = [{transform_indices = @transform_0, window_bounds = array<i64: 16, 32>}, {pipeline_mode = #tpu.pipeline_mode<synchronous>, transform_indices = @transform_1, window_bounds = array<i64: 32, 4>}, {pipeline_mode = #tpu.pipeline_mode<synchronous>, transform_indices = @transform_2, window_bounds = array<i64: 1, 4>}, {pipeline_mode = #tpu.pipeline_mode<synchronous>, transform_indices = @transform_3, window_bounds = array<i64: 4, 32>}, {pipeline_mode = #tpu.pipeline_mode<synchronous>, transform_indices = @transform_4, window_bounds = array<i64: 1, 32>}, {transform_indices = @transform_5, window_bounds = array<i64: 16, 32>}]} {
    %c0 = arith.constant 0 : index
    %c0_0 = arith.constant 0 : index
    %0 = vector.load %arg1[%c0, %c0_0] : memref<16x32xf32, #tpu.memory_space<vmem>>, vector<16x32xf32>
    %1 = arith.truncf %0 : vector<16x32xf32> to vector<16x32xbf16>
    %c0_1 = arith.constant 0 : index
    %c0_2 = arith.constant 0 : index
    %2 = vector.load %arg2[%c0_1, %c0_2] : memref<32x4xbf16, #tpu.memory_space<vmem>>, vector<32x4xbf16>
    %cst = arith.constant dense<0.000000e+00> : vector<16x4xf32>
    %3 = tpu.matmul %1, %2, %cst {dimension_numbers = #tpu.dot_dimension_numbers<[1], [0], [0], [1], [0, 0, 1, 1], [], []>} : vector<16x32xbf16>, vector<32x4xbf16>, vector<16x4xf32> -> vector<16x4xf32>
    %c0_3 = arith.constant 0 : index
    %c0_4 = arith.constant 0 : index
    %4 = vector.load %arg3[%c0_3, %c0_4] : memref<1x4xf32, #tpu.memory_space<vmem>>, vector<1x4xf32>
    %5 = vector.broadcast %4 : vector<1x4xf32> to vector<16x4xf32>
    %6 = arith.addf %3, %5 : vector<16x4xf32>
    %cst_5 = arith.constant 0.000000e+00 : f32
    %7 = vector.broadcast %cst_5 : f32 to vector<16x4xf32>
    %8 = arith.maximumf %6, %7 : vector<16x4xf32>
    %9 = arith.truncf %8 : vector<16x4xf32> to vector<16x4xbf16>
    %c0_6 = arith.constant 0 : index
    %c0_7 = arith.constant 0 : index
    %10 = vector.load %arg4[%c0_6, %c0_7] : memref<4x32xbf16, #tpu.memory_space<vmem>>, vector<4x32xbf16>
    %cst_8 = arith.constant dense<0.000000e+00> : vector<16x32xf32>
    %11 = tpu.matmul %9, %10, %cst_8 {dimension_numbers = #tpu.dot_dimension_numbers<[1], [0], [0], [1], [0, 0, 1, 1], [], []>} : vector<16x4xbf16>, vector<4x32xbf16>, vector<16x32xf32> -> vector<16x32xf32>
    %c0_9 = arith.constant 0 : index
    %c0_10 = arith.constant 0 : index
    %12 = vector.load %arg5[%c0_9, %c0_10] : memref<1x32xf32, #tpu.memory_space<vmem>>, vector<1x32xf32>
    %13 = vector.broadcast %12 : vector<1x32xf32> to vector<16x32xf32>
    %14 = arith.addf %11, %13 : vector<16x32xf32>
    %cst_11 = arith.constant 0.000000e+00 : f32
    %15 = vector.broadcast %cst_11 : f32 to vector<16x32xf32>
    %16 = arith.subf %15, %14 : vector<16x32xf32>
    %17 = math.exp %16 : vector<16x32xf32>
    %cst_12 = arith.constant 1.000000e+00 : f32
    %18 = vector.broadcast %cst_12 : f32 to vector<16x32xf32>
    %19 = arith.addf %18, %17 : vector<16x32xf32>
    %20 = tpu.reciprocal %19 {approx = true} : vector<16x32xf32> -> vector<16x32xf32>
    %21 = arith.mulf %0, %20 : vector<16x32xf32>
    %c0_13 = arith.constant 0 : index
    %c0_14 = arith.constant 0 : index
    %22 = vector.load %arg6[%c0_13, %c0_14] : memref<16x32xf32, #tpu.memory_space<vmem>>, vector<16x32xf32>
    tpu.vector_store %arg6[%c0_13, %c0_14], %21 {strides = array<i32>} : memref<16x32xf32, #tpu.memory_space<vmem>>, vector<16x32xf32>,
    return
  }
  func.func @transform_0(%arg0: i32) -> (i32, i32) {
    %c0_i32 = arith.constant 0 : i32
    %c0_i32_0 = arith.constant 0 : i32
    return %arg0, %c0_i32 : i32, i32
  }
  func.func @transform_1(%arg0: i32) -> (i32, i32) {
    %c0_i32 = arith.constant 0 : i32
    %c0_i32_0 = arith.constant 0 : i32
    %c0_i32_1 = arith.constant 0 : i32
    return %c0_i32, %c0_i32_0 : i32, i32
  }
  func.func @transform_2(%arg0: i32) -> (i32, i32) {
    %c0_i32 = arith.constant 0 : i32
    %c0_i32_0 = arith.constant 0 : i32
    %c0_i32_1 = arith.constant 0 : i32
    return %c0_i32, %c0_i32_0 : i32, i32
  }
  func.func @transform_3(%arg0: i32) -> (i32, i32) {
    %c0_i32 = arith.constant 0 : i32
    %c0_i32_0 = arith.constant 0 : i32
    %c0_i32_1 = arith.constant 0 : i32
    return %c0_i32, %c0_i32_0 : i32, i32
  }
  func.func @transform_4(%arg0: i32) -> (i32, i32) {
    %c0_i32 = arith.constant 0 : i32
    %c0_i32_0 = arith.constant 0 : i32
    %c0_i32_1 = arith.constant 0 : i32
    return %c0_i32, %c0_i32_0 : i32, i32
  }
  func.func @transform_5(%arg0: i32) -> (i32, i32) {
    %c0_i32 = arith.constant 0 : i32
    %c0_i32_0 = arith.constant 0 : i32
    return %arg0, %c0_i32 : i32, i32
  }
}

module attributes {stable_mosaic.version = 11 : i64} {
  func.func @se_block_kernel(%arg0: i32, %arg1: memref<16x32xf32, #tpu.memory_space<vmem>>, %arg2: memref<32x4xbf16, #tpu.memory_space<vmem>>, %arg3: memref<1x4xf32, #tpu.memory_space<vmem>>, %arg4: memref<4x32xbf16, #tpu.memory_space<vmem>>, %arg5: memref<1x32xf32, #tpu.memory_space<vmem>>, %arg6: memref<16x32xf32, #tpu.memory_space<vmem>>) attributes {dimension_semantics = [#tpu.dimension_semantics<parallel>], iteration_bounds = array<i64: 2>, scalar_prefetch = 0 : i64, scratch_operands = 0 : i64, tpu.core_type = #tpu.core_type<tc>, window_params = [{transform_indices = @transform_0, window_bounds = array<i64: 16, 32>}, {pipeline_mode = #tpu.pipeline_mode<synchronous>, transform_indices = @transform_1, window_bounds = array<i64: 32, 4>}, {pipeline_mode = #tpu.pipeline_mode<synchronous>, transform_indices = @transform_2, window_bounds = array<i64: 1, 4>}, {pipeline_mode = #tpu.pipeline_mode<synchronous>, transform_indices = @transform_3, window_bounds = array<i64: 4, 32>}, {pipeline_mode = #tpu.pipeline_mode<synchronous>, transform_indices = @transform_4, window_bounds = array<i64: 1, 32>}, {transform_indices = @transform_5, window_bounds = array<i64: 16, 32>}]} {
    %c0 = arith.constant 0 : index
    %c0_0 = arith.constant 0 : index
    %0 = vector.load %arg1[%c0, %c0_0] : memref<16x32xf32, #tpu.memory_space<vmem>>, vector<16x32xf32>
    %1 = arith.truncf %0 : vector<16x32xf32> to vector<16x32xbf16>
    %c0_1 = arith.constant 0 : index
    %c0_2 = arith.constant 0 : index
    %2 = vector.load %arg2[%c0_1, %c0_2] : memref<32x4xbf16, #tpu.memory_space<vmem>>, vector<32x4xbf16>
    %cst = arith.constant dense<0.000000e+00> : vector<16x4xf32>
    %3 = tpu.matmul %1, %2, %cst {dimension_numbers = #tpu.dot_dimension_numbers<[1], [0], [0], [1], [0, 0, 1, 1], [], []>} : vector<16x32xbf16>, vector<32x4xbf16>, vector<16x4xf32> -> vector<16x4xf32>
    %c0_3 = arith.constant 0 : index
    %c0_4 = arith.constant 0 : index
    %4 = vector.load %arg3[%c0_3, %c0_4] : memref<1x4xf32, #tpu.memory_space<vmem>>, vector<1x4xf32>
    %5 = vector.broadcast %4 : vector<1x4xf32> to vector<16x4xf32>
    %6 = arith.addf %3, %5 : vector<16x4xf32>
    %cst_5 = arith.constant 0.000000e+00 : f32
    %7 = vector.broadcast %cst_5 : f32 to vector<16x4xf32>
    %8 = arith.maximumf %6, %7 : vector<16x4xf32>
    %9 = arith.truncf %8 : vector<16x4xf32> to vector<16x4xbf16>
    %c0_6 = arith.constant 0 : index
    %c0_7 = arith.constant 0 : index
    %10 = vector.load %arg4[%c0_6, %c0_7] : memref<4x32xbf16, #tpu.memory_space<vmem>>, vector<4x32xbf16>
    %cst_8 = arith.constant dense<0.000000e+00> : vector<16x32xf32>
    %11 = tpu.matmul %9, %10, %cst_8 {dimension_numbers = #tpu.dot_dimension_numbers<[1], [0], [0], [1], [0, 0, 1, 1], [], []>} : vector<16x4xbf16>, vector<4x32xbf16>, vector<16x32xf32> -> vector<16x32xf32>
    %c0_9 = arith.constant 0 : index
    %c0_10 = arith.constant 0 : index
    %12 = vector.load %arg5[%c0_9, %c0_10] : memref<1x32xf32, #tpu.memory_space<vmem>>, vector<1x32xf32>
    %13 = vector.broadcast %12 : vector<1x32xf32> to vector<16x32xf32>
    %14 = arith.addf %11, %13 : vector<16x32xf32>
    %cst_11 = arith.constant 0.000000e+00 : f32
    %15 = vector.broadcast %cst_11 : f32 to vector<16x32xf32>
    %16 = arith.subf %15, %14 : vector<16x32xf32>
    %17 = math.exp %16 : vector<16x32xf32>
    %cst_12 = arith.constant 1.000000e+00 : f32
    %18 = vector.broadcast %cst_12 : f32 to vector<16x32xf32>
    %19 = arith.addf %18, %17 : vector<16x32xf32>
    %20 = tpu.reciprocal %19 {approx = true} : vector<16x32xf32> -> vector<16x32xf32>
    %21 = arith.mulf %0, %20 : vector<16x32xf32>
    %c0_13 = arith.constant 0 : index
    %c0_14 = arith.constant 0 : index
    %22 = vector.load %arg6[%c0_13, %c0_14] : memref<16x32xf32, #tpu.memory_space<vmem>>, vector<16x32xf32>
    tpu.vector_store %arg6[%c0_13, %c0_14], %21 {strides = array<i32>} : memref<16x32xf32, #tpu.memory_space<vmem>>, vector<16x32xf32>,
    return
  }
  func.func @transform_0(%arg0: i32) -> (i32, i32) {
    %c0_i32 = arith.constant 0 : i32
    %c0_i32_0 = arith.constant 0 : i32
    return %arg0, %c0_i32 : i32, i32
  }
  func.func @transform_1(%arg0: i32) -> (i32, i32) {
    %c0_i32 = arith.constant 0 : i32
    %c0_i32_0 = arith.constant 0 : i32
    %c0_i32_1 = arith.constant 0 : i32
    return %c0_i32, %c0_i32_0 : i32, i32
  }
  func.func @transform_2(%arg0: i32) -> (i32, i32) {
    %c0_i32 = arith.constant 0 : i32
    %c0_i32_0 = arith.constant 0 : i32
    %c0_i32_1 = arith.constant 0 : i32
    return %c0_i32, %c0_i32_0 : i32, i32
  }
  func.func @transform_3(%arg0: i32) -> (i32, i32) {
    %c0_i32 = arith.constant 0 : i32
    %c0_i32_0 = arith.constant 0 : i32
    %c0_i32_1 = arith.constant 0 : i32
    return %c0_i32, %c0_i32_0 : i32, i32
  }
  func.func @transform_4(%arg0: i32) -> (i32, i32) {
    %c0_i32 = arith.constant 0 : i32
    %c0_i32_0 = arith.constant 0 : i32
    %c0_i32_1 = arith.constant 0 : i32
    return %c0_i32, %c0_i32_0 : i32, i32
  }
  func.func @transform_5(%arg0: i32) -> (i32, i32) {
    %c0_i32 = arith.constant 0 : i32
    %c0_i32_0 = arith.constant 0 : i32
    return %arg0, %c0_i32 : i32, i32
  }
}

</mosaic_0001>

<bundles_post_ra>
// kernel: tpu_custom_call.1
= control target key start
LH: loop header
LB: loop body
LE: loop exit
PB: predicated region body
PF: predicated region fallthrough
CT: control target
= control target key end

     0   :  { %10 = vsyncpa [#allocation3], 0  ;;  %s901_s0 = inlined_call_operand.hbm [shape: f32[32,32], index: 0, kind: input, shape index: {}]   ;;  %s902_s1 = inlined_call_operand.vmem [shape: bf16[32,4], index: 1, kind: input, shape index: {}]   ;;  %s903_s2 = inlined_call_operand.vmem [shape: f32[1,4], index: 2, kind: input, shape index: {}]   ;;  %s904_s3 = inlined_call_operand.vmem [shape: bf16[4,32], index: 3, kind: input, shape index: {}]   ;;  %s905_s4 = inlined_call_operand.vmem [shape: f32[1,32], index: 4, kind: input, shape index: {}]   ;;  %s906_s5 = inlined_call_operand.hbm [shape: f32[32,32], index: 5, kind: output, shape index: {}]  }
   0x1   :  { %12 = vsyncpa [#allocation3 + $0x1], 0 }
   0x2   :  { %13 = vsyncpa [#allocation4], 0 }
   0x3   :  { %15 = vsyncpa [#allocation4 + $0x1], 0  ;;  %s717_s18 = smov 0   ;;  %s719_s19 = smov 0  }
   0x4   :  { %s721_s20 = smov 0   ;;  %s723_s21 = smov 0  }
   0x5 LB: > { %s738_s22 = sadd.s32 4294967295, %s677_s21   ;;  %s478_s23 = sadd.s32 4294967294, %s677_s21   ;;  %s677_s21 = sphi %s723_s21, %s919_s21   ;;  %s673_s20 = sphi %s721_s20, %s918_s20   ;;  %s669_s19 = sphi %s719_s19, %s917_s19   ;;  %s665_s18 = sphi %s717_s18, %s916_s18  }
   0x6   : > { %s742_s24 = sadd.s32 1, %s677_s21   ;;  %s28_s25 = sadd.s32 1, %s673_s20 }
   0x7   : > { %s25_s26 = ssub.s32 %s677_s21, %s742_s24  ;;  %p35_p0 = scmp.ne.s32.totalorder %s673_s20, %s669_s19 }
   0x8   : > { %p26_p1 = scmp.eq.s32.totalorder %s25_s26, 0  ;;  %p36_p2 = scmp.eq.s32.totalorder %s677_s21, 0 }
   0x9   : > { %p41_p3 = scmp.ne.s32.totalorder %s669_s19, %s665_s18  ;;  %p42_p4 = scmp.eq.s32.totalorder %s738_s22, 0 }
   0xa   : > { %s754_s27 = scalar_select %p26_p1, %s673_s20, %s28_s25  }
   0xb   : > { %p756_p5 = por %p36_p2, %p35_p0  ;;  %p760_p6 = por %p42_p4, %p41_p3 }
   0xc   : > { %p149_p7 = scmp.eq.s32.totalorder %s738_s22, 1  ;;  %p155_p8 = scmp.eq.s32.totalorder %s478_s23, 1 }
   0xd   : > { %p531_p10 = scmp.lt.s32.totalorder %s677_s21, 2  ;;  %s187_s7 = sand.u32 1, %s673_s20  }
   0xe   : > { %p767_p11 = por %p149_p7, %p35_p0  ;;  %p771_p12 = por %p155_p8, %p41_p3 }
   0xf   : > { %s498_s8 = sshll.u32 %s677_s21, 8  ;;  %s481_s9 = sshll.u32 %s187_s7, 4 }
  0x10   : > { %s910_s30 = scalar_select %p767_p11, 1, 0 }
  0x11   : > { %s911_s6 = scalar_select %p771_p12, 1, 0 }
  0x12   : > { %s780_s12 = scalar_lea.hbm %s901_s0, %s498_s8  ;;  %s191_s13 = scalar_lea.vmem [#allocation2], %s481_s9 }
  0x13   : > { %s198_s14 = sshll.u32 %s191_s13, 4  ;;  %p784_p13 = pnand %p531_p10, %p756_p5  ;;  %s788_s14 = int_to_ptr.vmem [resolvable:$true] %s198_s14 }
  0x14   : > { %s790_s16 = scalar_lea.sflag [#allocation3], %s187_s7  ;;  %s581_s17 = scalar_lea.hbm %s780_s12, 256 }
  0x15   : > { %p582_p0 = scmp.ne.s32.totalorder %s780_s12, %s581_s17  ;;  %p583_p1 = pneg %p784_p13 }
  0x16   : > { %s586_s26 = scalar_lea.hbm %s901_s0, 512  ;;  %p587_p4 = scmp.lt.u32.totalorder %s780_s12, %s901_s0 }
  0x17   : > { %p584_p2 = pnand %p583_p1, %p582_p0  ;;  %p588_p5 = scmp.lt.u32.totalorder %s586_s26, %s581_s17 }
  0x18   : > { %p590_p8 = scmp.lt.u32.totalorder %s581_s17, %s780_s12 }
  0x19   : > { %p585_p3 = pneg %p584_p2  ;;  %p589_p7 = por %p588_p5, %p587_p4 }
  0x1b   : > { %p591_p10 = por %p590_p8, %p589_p7 }
  0x1d   : > { %p592_p9 = pnand %p591_p10, %p585_p3 }
  0x1f   : > { %595 = shalt.err (!%p592_p9)
}
  0x20   : > { %s596_s7 = scalar_lea.vmem %s788_s14, 256  ;;  %s679_s9 = smov [#allocation2]  }
  0x21   : > { %p597_p0 = scmp.ne.s32.totalorder %s788_s14, %s596_s7  ;;  %s601_s10 = sshll.u32 %s679_s9, 4  ;;  %s602_s10 = int_to_ptr.vmem [resolvable:$false] %s601_s10 }
  0x22   : > { %s603_s11 = scalar_lea.vmem %s602_s10, 512  ;;  %p604_p11 = scmp.lt.s32.totalorder %s788_s14, %s602_s10 }
  0x23   : > { %p599_p2 = pnand %p597_p0, %p583_p1  ;;  %p605_p4 = scmp.lt.s32.totalorder %s603_s11, %s596_s7 }
  0x25   : > { %p600_p12 = pneg %p599_p2  ;;  %p606_p5 = por %p605_p4, %p604_p11 }
  0x27   : > { %p607_p7 = pnand %p606_p5, %p600_p12 }
  0x29   : > { %610 = shalt.err (!%p607_p7)
}
  0x2a   : > { %s680_s13 = smov 128   ;;  %s681_s17 = smov 8  }
  0x2b   : > { %526 = dma.hbm_to_vmem [thread:$0]  (!%p784_p13), %s780_s12, 256, %s788_s14, %s790_s16, %s680_s13, %s680_s13, %s681_s17  }
  0x2c   : > { %p484_p9 = scmp.ge.s32.totalorder %s677_s21, 1  ;;  %p206_p1 = scmp.lt.s32.totalorder %s677_s21, 3 }
  0x2e   : > { %p207_p3 = pnand %p484_p9, %p206_p1 }
  0x2f   : > { %s821_s23 = sand.u32 (!%p207_p3), 1, %s669_s19  }
  0x30   : > { %210 = sbr.rel (%p207_p3) target bundleno = 547 (0x223), region = 40  ;;  %s485_s25 = sshll.u32 (!%p207_p3), %s821_s23, 4 }
  0x31   : > { %s213_s26 = scalar_lea.sflag (!%p207_p3), [#allocation3], %s821_s23  ;;  %s216_s28 = scalar_lea.vmem (!%p207_p3), [#allocation2], %s485_s25 }
  0x37   : > { %656 = dma.done.wait (%p760_p6), %s213_s26, 256  }
  0x38   : > { %658 = vsyncadd (%p760_p6), %s213_s26, 4294967040  ;;  %v682_v0 = vmov 0.0   ;;  %vm683_vm0 = vmmov 0   ;;  %v571_v1 = vld [vmem:[%s902_s1] sm:$0xff]   ;;  %v572_v2 = vld [vmem:[%s902_s1 + $0x8] sm:$0xff]   ;;  %vm272_vm1 = vcmask 261120  }
  0x39   : > { %505 = vmatprep.subr.bf16.mxu0 %v682_v0  ;;  %509 = vmatprep.mubr.msk.bf16.mxu0 %vm683_vm0, %v682_v0  ;;  %v246_v3 = vld [vmem:[%s216_s28] sm:$0xff]  ;;  %v247_v4 = vld [vmem:[%s216_s28 + $0x8] sm:$0xff]  ;;  %vm332_vm2 = vcmask 1041408   ;;  %vm328_vm3 = vcmask 31744   ;;  %s499_s13 = sshll.u32 %s738_s22, 8  ;;  %s242_s17 = scalar_lea.vmem [#allocation5], %s485_s25 }
  0x3a   : > { %513 = vmatprep.subr.bf16.mxu1 %v682_v0  ;;  %515 = vmatprep.mubr.msk.bf16.mxu1 %vm683_vm0, %v682_v0  ;;  %v248_v5 = vpack.c.bf16 %v247_v4, %v246_v3  ;;  %v320_v6 = vld [vmem:[%s904_s3] sm:$0x3]  ;;  %s405_s26 = sshll.u32 %s242_s17, 4  ;;  %s853_s14 = scalar_lea.hbm %s906_s5, %s499_s13  ;;  %s855_s26 = int_to_ptr.vmem [resolvable:$true] %s405_s26 }
  0x3b   : > { %506 = vmatpush3.bf16.msra.mxu0 %v571_v1  ;;  %v334_v7 = vsel %vm332_vm2, %v320_v6, 0  ;;  %v487_v8 = vld [vmem:[%s903_s2] ss:$0 sm:$0xff]  ;;  %s392_s22 = scalar_lea.sflag [#allocation4], %s821_s23  ;;  %s611_s25 = scalar_lea.vmem %s855_s26, 256 }
  0x3c   : > { %507 = vmatprep.subr.bf16.mxu0 %v682_v0  ;;  %514 = vmatpush3.bf16.msra.mxu1 %v334_v7  ;;  %v491_v18 = vld [vmem:[%s905_s4] ss:$0 sm:$0xff]  ;;  %p612_p6 = scmp.ne.s32.totalorder %s855_s26, %s611_s25  ;;  %p913_p11 = scmp.ne.s32.totalorder %s910_s30, 0 }
  0x3d   : > { %s684_s15 = smov [#allocation5]  }
  0x3e   : > { %p613_p12 = pnand %p612_p6, %p913_p11  ;;  %s615_s16 = sshll.u32 %s684_s15, 4  ;;  %s616_s16 = int_to_ptr.vmem [resolvable:$false] %s615_s16 }
  0x3f   : > { %508 = vmatpush3.bf16.msra.mxu0 %v572_v2  ;;  %s617_s29 = scalar_lea.vmem %s616_s16, 512  ;;  %p618_p8 = scmp.lt.s32.totalorder %s855_s26, %s616_s16 }
  0x40   : > { %p614_p13 = pneg %p613_p12  ;;  %p619_p10 = scmp.lt.s32.totalorder %s617_s29, %s611_s25 }
  0x42   : > { %510 = vmatmul.mubr.msk.bf16.vlgmr.msra.gmra.mrb[0].mxu0 %vm272_vm1, %v248_v5  ;;  %p620_p0 = por %p619_p10, %p618_p8 }
  0x44   : > { %p621_p2 = pnand %p620_p0, %p614_p13 }
 0x115   : > { %v310_v9 = vpop.f32.mrb[0].mxu0 }
 0x116   : > { %v311_v10 = vadd.f32 %v487_v8, %v310_v9  ;;  %v511_v11 = vpop.f32.mrb[1].mxu0 }
 0x117   : > { %v313_v12 = vpop.f32.mrb[2].mxu0 }
 0x118   : > { %v314_v13 = vadd.f32 %v487_v8, %v313_v12  ;;  %v512_v14 = vpop.f32.mrb[3].mxu0  ;;  %v317_v15 = vmax.f32 %v311_v10, 0.0 }
 0x11a   : > { %v318_v16 = vmax.f32 %v314_v13, 0.0 }
 0x11c   : > { %v319_v17 = vpack.c.bf16 %v318_v16, %v317_v15 }
 0x11e   : > { %516 = vmatmul.mubr.msk.bf16.vlgmr.msra.gmra.mrb[0].mxu1 %vm328_vm3, %v319_v17 }
 0x1f1   : > { %v370_v19 = vpop.f32.mrb[0].mxu1 }
 0x1f2   : > { %v371_v20 = vadd.f32 %v491_v18, %v370_v19  ;;  %v517_v21 = vpop.f32.mrb[1].mxu1 }
 0x1f3   : > { %v373_v22 = vpop.f32.mrb[2].mxu1 }
 0x1f4   : > { %v377_v23 = vsub.f32 0.0, %v371_v20  ;;  %v374_v24 = vadd.f32 %v491_v18, %v373_v22  ;;  %v518_v25 = vpop.f32.mrb[3].mxu1 }
 0x1f6   : > { %v379_v26 = vmul.f32 1.442695, %v377_v23  ;;  %v378_v27 = vsub.f32 0.0, %v374_v24 }
 0x1f8   : > { %573 = vpow2.f32 %v379_v26  ;;  %v381_v28 = vmul.f32 1.442695, %v378_v27 }
 0x1fa   : > { %575 = vpow2.f32 %v381_v28 }
 0x202   : > { %v574_v29 = vpop.eup %573 }
 0x203   : > { %v383_v30 = vadd.f32 1.0, %v574_v29 }
 0x204   : > { %v576_v31 = vpop.eup %575 }
 0x205   : > { %577 = vrcp.f32 %v383_v30  ;;  %v384_v32 = vadd.f32 1.0, %v576_v31 }
 0x207   : > { %579 = vrcp.f32 %v384_v32 }
 0x20f   : > { %v578_v33 = vpop.eup %577 }
 0x210   : > { %v387_v34 = vmul.f32 %v578_v33, %v246_v3 }
 0x211   : > { %v580_v35 = vpop.eup %579 }
 0x212   : > { %v388_v36 = vmul.f32 %v580_v35, %v247_v4  ;;  %389 = vst.msk [vmem:[%s242_s17] sm:$0xff] %vm272_vm1, %v387_v34 }
 0x214   : > { %390 = vst.msk [vmem:[%s242_s17 + $0x8] sm:$0xff] %vm272_vm1, %v388_v36 }
 0x215   : > { %624 = shalt.err (!%p621_p2)
}
 0x216   : > { %s625_s8 = scalar_lea.hbm %s853_s14, 256  ;;  %s629_s10 = scalar_lea.hbm %s906_s5, 512 }
 0x217   : > { %p626_p4 = scmp.ne.s32.totalorder %s853_s14, %s625_s8  ;;  %p630_p9 = scmp.lt.u32.totalorder %s853_s14, %s906_s5 }
 0x218   : > { %p631_p1 = scmp.lt.u32.totalorder %s629_s10, %s625_s8  ;;  %p633_p6 = scmp.lt.u32.totalorder %s625_s8, %s853_s14 }
 0x219   : > { %p627_p5 = pnand %p626_p4, %p913_p11 }
 0x21a   : > { %p632_p3 = por %p631_p1, %p630_p9 }
 0x21b   : > { %p628_p7 = pneg %p627_p5 }
 0x21c   : > { %p634_p12 = por %p633_p6, %p632_p3 }
 0x21e   : > { %p635_p13 = pnand %p634_p12, %p628_p7 }
 0x220   : > { %638 = shalt.err (!%p635_p13)
}
 0x221   : > { %s685_s17 = smov 128   ;;  %s686_s28 = smov 8  }
 0x222   : > { %521 = dma.vmem_to_hbm [thread:$0]  (%p913_p11), %s855_s26, 256, %s853_s14, %s392_s22, %s685_s17, %s685_s17, %s686_s28  }
 0x223 PF: > { %s420_s12 = sand.u32 1, %s665_s18   ;;  %p914_p8 = scmp.ne.s32.totalorder %s911_s6, 0 }
 0x224   : > { %p915_p10 = scmp.ge.s32.totalorder %s677_s21, 2  ;;  %s421_s25 = scalar_lea.sflag [#allocation4], %s420_s12 }
 0x226   : > { %p528_p0 = pnand %p915_p10, %p914_p8 }
 0x228   : > { %660 = dma.done.wait (!%p528_p0), %s421_s25, 256  }
 0x229   : > { %662 = vsyncadd (!%p528_p0), %s421_s25, 4294967040  ;;  %p18_p2 = scmp.ge.s32.totalorder %s742_s24, 4   ;;  %s916_s18 = smov %s669_s19 }
 0x22a   : > { %s917_s19 = smov %s673_s20  ;;  %s918_s20 = smov %s754_s27 }
 0x22b   : > { %s919_s21 = smov %s742_s24  ;;  %20 = sbr.rel (!%p18_p2) target bundleno = 5 (0x5), region = 85 }
 0x232   :  { %426 = vsyncpa [#allocation3], 1 }
 0x233   :  { %428 = vsyncpa [#allocation3 + $0x1], 1 }
 0x234   :  { %429 = vsyncpa [#allocation4], 1 }
 0x235   :  { %431 = vsyncpa [#allocation4 + $0x1], 1 }

// kernel: tpu_custom_call.1
= control target key start
LH: loop header
LB: loop body
LE: loop exit
PB: predicated region body
PF: predicated region fallthrough
CT: control target
= control target key end

     0   :  { %10 = vsyncpa [#allocation3], 0  ;;  %s901_s0 = inlined_call_operand.hbm [shape: f32[32,32], index: 0, kind: input, shape index: {}]   ;;  %s902_s1 = inlined_call_operand.vmem [shape: bf16[32,4], index: 1, kind: input, shape index: {}]   ;;  %s903_s2 = inlined_call_operand.vmem [shape: f32[1,4], index: 2, kind: input, shape index: {}]   ;;  %s904_s3 = inlined_call_operand.vmem [shape: bf16[4,32], index: 3, kind: input, shape index: {}]   ;;  %s905_s4 = inlined_call_operand.vmem [shape: f32[1,32], index: 4, kind: input, shape index: {}]   ;;  %s906_s5 = inlined_call_operand.hbm [shape: f32[32,32], index: 5, kind: output, shape index: {}]  }
   0x1   :  { %12 = vsyncpa [#allocation3 + $0x1], 0 }
   0x2   :  { %13 = vsyncpa [#allocation4], 0 }
   0x3   :  { %15 = vsyncpa [#allocation4 + $0x1], 0  ;;  %s717_s18 = smov 0   ;;  %s719_s19 = smov 0  }
   0x4   :  { %s721_s20 = smov 0   ;;  %s723_s21 = smov 0  }
   0x5 LB: > { %s738_s22 = sadd.s32 4294967295, %s677_s21   ;;  %s478_s23 = sadd.s32 4294967294, %s677_s21   ;;  %s677_s21 = sphi %s723_s21, %s919_s21   ;;  %s673_s20 = sphi %s721_s20, %s918_s20   ;;  %s669_s19 = sphi %s719_s19, %s917_s19   ;;  %s665_s18 = sphi %s717_s18, %s916_s18  }
   0x6   : > { %s742_s24 = sadd.s32 1, %s677_s21   ;;  %s28_s25 = sadd.s32 1, %s673_s20 }
   0x7   : > { %s25_s26 = ssub.s32 %s677_s21, %s742_s24  ;;  %p35_p0 = scmp.ne.s32.totalorder %s673_s20, %s669_s19 }
   0x8   : > { %p26_p1 = scmp.eq.s32.totalorder %s25_s26, 0  ;;  %p36_p2 = scmp.eq.s32.totalorder %s677_s21, 0 }
   0x9   : > { %p41_p3 = scmp.ne.s32.totalorder %s669_s19, %s665_s18  ;;  %p42_p4 = scmp.eq.s32.totalorder %s738_s22, 0 }
   0xa   : > { %s754_s27 = scalar_select %p26_p1, %s673_s20, %s28_s25  }
   0xb   : > { %p756_p5 = por %p36_p2, %p35_p0  ;;  %p760_p6 = por %p42_p4, %p41_p3 }
   0xc   : > { %p149_p7 = scmp.eq.s32.totalorder %s738_s22, 1  ;;  %p155_p8 = scmp.eq.s32.totalorder %s478_s23, 1 }
   0xd   : > { %p531_p10 = scmp.lt.s32.totalorder %s677_s21, 2  ;;  %s187_s7 = sand.u32 1, %s673_s20  }
   0xe   : > { %p767_p11 = por %p149_p7, %p35_p0  ;;  %p771_p12 = por %p155_p8, %p41_p3 }
   0xf   : > { %s498_s8 = sshll.u32 %s677_s21, 8  ;;  %s481_s9 = sshll.u32 %s187_s7, 4 }
  0x10   : > { %s910_s30 = scalar_select %p767_p11, 1, 0 }
  0x11   : > { %s911_s6 = scalar_select %p771_p12, 1, 0 }
  0x12   : > { %s780_s12 = scalar_lea.hbm %s901_s0, %s498_s8  ;;  %s191_s13 = scalar_lea.vmem [#allocation2], %s481_s9 }
  0x13   : > { %s198_s14 = sshll.u32 %s191_s13, 4  ;;  %p784_p13 = pnand %p531_p10, %p756_p5  ;;  %s788_s14 = int_to_ptr.vmem [resolvable:$true] %s198_s14 }
  0x14   : > { %s790_s16 = scalar_lea.sflag [#allocation3], %s187_s7  ;;  %s581_s17 = scalar_lea.hbm %s780_s12, 256 }
  0x15   : > { %p582_p0 = scmp.ne.s32.totalorder %s780_s12, %s581_s17  ;;  %p583_p1 = pneg %p784_p13 }
  0x16   : > { %s586_s26 = scalar_lea.hbm %s901_s0, 512  ;;  %p587_p4 = scmp.lt.u32.totalorder %s780_s12, %s901_s0 }
  0x17   : > { %p584_p2 = pnand %p583_p1, %p582_p0  ;;  %p588_p5 = scmp.lt.u32.totalorder %s586_s26, %s581_s17 }
  0x18   : > { %p590_p8 = scmp.lt.u32.totalorder %s581_s17, %s780_s12 }
  0x19   : > { %p585_p3 = pneg %p584_p2  ;;  %p589_p7 = por %p588_p5, %p587_p4 }
  0x1b   : > { %p591_p10 = por %p590_p8, %p589_p7 }
  0x1d   : > { %p592_p9 = pnand %p591_p10, %p585_p3 }
  0x1f   : > { %595 = shalt.err (!%p592_p9)
}
  0x20   : > { %s596_s7 = scalar_lea.vmem %s788_s14, 256  ;;  %s679_s9 = smov [#allocation2]  }
  0x21   : > { %p597_p0 = scmp.ne.s32.totalorder %s788_s14, %s596_s7  ;;  %s601_s10 = sshll.u32 %s679_s9, 4  ;;  %s602_s10 = int_to_ptr.vmem [resolvable:$false] %s601_s10 }
  0x22   : > { %s603_s11 = scalar_lea.vmem %s602_s10, 512  ;;  %p604_p11 = scmp.lt.s32.totalorder %s788_s14, %s602_s10 }
  0x23   : > { %p599_p2 = pnand %p597_p0, %p583_p1  ;;  %p605_p4 = scmp.lt.s32.totalorder %s603_s11, %s596_s7 }
  0x25   : > { %p600_p12 = pneg %p599_p2  ;;  %p606_p5 = por %p605_p4, %p604_p11 }
  0x27   : > { %p607_p7 = pnand %p606_p5, %p600_p12 }
  0x29   : > { %610 = shalt.err (!%p607_p7)
}
  0x2a   : > { %s680_s13 = smov 128   ;;  %s681_s17 = smov 8  }
  0x2b   : > { %526 = dma.hbm_to_vmem [thread:$0]  (!%p784_p13), %s780_s12, 256, %s788_s14, %s790_s16, %s680_s13, %s680_s13, %s681_s17  }
  0x2c   : > { %p484_p9 = scmp.ge.s32.totalorder %s677_s21, 1  ;;  %p206_p1 = scmp.lt.s32.totalorder %s677_s21, 3 }
  0x2e   : > { %p207_p3 = pnand %p484_p9, %p206_p1 }
  0x2f   : > { %s821_s23 = sand.u32 (!%p207_p3), 1, %s669_s19  }
  0x30   : > { %210 = sbr.rel (%p207_p3) target bundleno = 547 (0x223), region = 40  ;;  %s485_s25 = sshll.u32 (!%p207_p3), %s821_s23, 4 }
  0x31   : > { %s213_s26 = scalar_lea.sflag (!%p207_p3), [#allocation3], %s821_s23  ;;  %s216_s28 = scalar_lea.vmem (!%p207_p3), [#allocation2], %s485_s25 }
  0x37   : > { %656 = dma.done.wait (%p760_p6), %s213_s26, 256  }
  0x38   : > { %658 = vsyncadd (%p760_p6), %s213_s26, 4294967040  ;;  %v682_v0 = vmov 0.0   ;;  %vm683_vm0 = vmmov 0   ;;  %v571_v1 = vld [vmem:[%s902_s1] sm:$0xff]   ;;  %v572_v2 = vld [vmem:[%s902_s1 + $0x8] sm:$0xff]   ;;  %vm272_vm1 = vcmask 261120  }
  0x39   : > { %505 = vmatprep.subr.bf16.mxu0 %v682_v0  ;;  %509 = vmatprep.mubr.msk.bf16.mxu0 %vm683_vm0, %v682_v0  ;;  %v246_v3 = vld [vmem:[%s216_s28] sm:$0xff]  ;;  %v247_v4 = vld [vmem:[%s216_s28 + $0x8] sm:$0xff]  ;;  %vm332_vm2 = vcmask 1041408   ;;  %vm328_vm3 = vcmask 31744   ;;  %s499_s13 = sshll.u32 %s738_s22, 8  ;;  %s242_s17 = scalar_lea.vmem [#allocation5], %s485_s25 }
  0x3a   : > { %513 = vmatprep.subr.bf16.mxu1 %v682_v0  ;;  %515 = vmatprep.mubr.msk.bf16.mxu1 %vm683_vm0, %v682_v0  ;;  %v248_v5 = vpack.c.bf16 %v247_v4, %v246_v3  ;;  %v320_v6 = vld [vmem:[%s904_s3] sm:$0x3]  ;;  %s405_s26 = sshll.u32 %s242_s17, 4  ;;  %s853_s14 = scalar_lea.hbm %s906_s5, %s499_s13  ;;  %s855_s26 = int_to_ptr.vmem [resolvable:$true] %s405_s26 }
  0x3b   : > { %506 = vmatpush3.bf16.msra.mxu0 %v571_v1  ;;  %v334_v7 = vsel %vm332_vm2, %v320_v6, 0  ;;  %v487_v8 = vld [vmem:[%s903_s2] ss:$0 sm:$0xff]  ;;  %s392_s22 = scalar_lea.sflag [#allocation4], %s821_s23  ;;  %s611_s25 = scalar_lea.vmem %s855_s26, 256 }
  0x3c   : > { %507 = vmatprep.subr.bf16.mxu0 %v682_v0  ;;  %514 = vmatpush3.bf16.msra.mxu1 %v334_v7  ;;  %v491_v18 = vld [vmem:[%s905_s4] ss:$0 sm:$0xff]  ;;  %p612_p6 = scmp.ne.s32.totalorder %s855_s26, %s611_s25  ;;  %p913_p11 = scmp.ne.s32.totalorder %s910_s30, 0 }
  0x3d   : > { %s684_s15 = smov [#allocation5]  }
  0x3e   : > { %p613_p12 = pnand %p612_p6, %p913_p11  ;;  %s615_s16 = sshll.u32 %s684_s15, 4  ;;  %s616_s16 = int_to_ptr.vmem [resolvable:$false] %s615_s16 }
  0x3f   : > { %508 = vmatpush3.bf16.msra.mxu0 %v572_v2  ;;  %s617_s29 = scalar_lea.vmem %s616_s16, 512  ;;  %p618_p8 = scmp.lt.s32.totalorder %s855_s26, %s616_s16 }
  0x40   : > { %p614_p13 = pneg %p613_p12  ;;  %p619_p10 = scmp.lt.s32.totalorder %s617_s29, %s611_s25 }
  0x42   : > { %510 = vmatmul.mubr.msk.bf16.vlgmr.msra.gmra.mrb[0].mxu0 %vm272_vm1, %v248_v5  ;;  %p620_p0 = por %p619_p10, %p618_p8 }
  0x44   : > { %p621_p2 = pnand %p620_p0, %p614_p13 }
 0x115   : > { %v310_v9 = vpop.f32.mrb[0].mxu0 }
 0x116   : > { %v311_v10 = vadd.f32 %v487_v8, %v310_v9  ;;  %v511_v11 = vpop.f32.mrb[1].mxu0 }
 0x117   : > { %v313_v12 = vpop.f32.mrb[2].mxu0 }
 0x118   : > { %v314_v13 = vadd.f32 %v487_v8, %v313_v12  ;;  %v512_v14 = vpop.f32.mrb[3].mxu0  ;;  %v317_v15 = vmax.f32 %v311_v10, 0.0 }
 0x11a   : > { %v318_v16 = vmax.f32 %v314_v13, 0.0 }
 0x11c   : > { %v319_v17 = vpack.c.bf16 %v318_v16, %v317_v15 }
 0x11e   : > { %516 = vmatmul.mubr.msk.bf16.vlgmr.msra.gmra.mrb[0].mxu1 %vm328_vm3, %v319_v17 }
 0x1f1   : > { %v370_v19 = vpop.f32.mrb[0].mxu1 }
 0x1f2   : > { %v371_v20 = vadd.f32 %v491_v18, %v370_v19  ;;  %v517_v21 = vpop.f32.mrb[1].mxu1 }
 0x1f3   : > { %v373_v22 = vpop.f32.mrb[2].mxu1 }
 0x1f4   : > { %v377_v23 = vsub.f32 0.0, %v371_v20  ;;  %v374_v24 = vadd.f32 %v491_v18, %v373_v22  ;;  %v518_v25 = vpop.f32.mrb[3].mxu1 }
 0x1f6   : > { %v379_v26 = vmul.f32 1.442695, %v377_v23  ;;  %v378_v27 = vsub.f32 0.0, %v374_v24 }
 0x1f8   : > { %573 = vpow2.f32 %v379_v26  ;;  %v381_v28 = vmul.f32 1.442695, %v378_v27 }
 0x1fa   : > { %575 = vpow2.f32 %v381_v28 }
 0x202   : > { %v574_v29 = vpop.eup %573 }
 0x203   : > { %v383_v30 = vadd.f32 1.0, %v574_v29 }
 0x204   : > { %v576_v31 = vpop.eup %575 }
 0x205   : > { %577 = vrcp.f32 %v383_v30  ;;  %v384_v32 = vadd.f32 1.0, %v576_v31 }
 0x207   : > { %579 = vrcp.f32 %v384_v32 }
 0x20f   : > { %v578_v33 = vpop.eup %577 }
 0x210   : > { %v387_v34 = vmul.f32 %v578_v33, %v246_v3 }
 0x211   : > { %v580_v35 = vpop.eup %579 }
 0x212   : > { %v388_v36 = vmul.f32 %v580_v35, %v247_v4  ;;  %389 = vst.msk [vmem:[%s242_s17] sm:$0xff] %vm272_vm1, %v387_v34 }
 0x214   : > { %390 = vst.msk [vmem:[%s242_s17 + $0x8] sm:$0xff] %vm272_vm1, %v388_v36 }
 0x215   : > { %624 = shalt.err (!%p621_p2)
}
 0x216   : > { %s625_s8 = scalar_lea.hbm %s853_s14, 256  ;;  %s629_s10 = scalar_lea.hbm %s906_s5, 512 }
 0x217   : > { %p626_p4 = scmp.ne.s32.totalorder %s853_s14, %s625_s8  ;;  %p630_p9 = scmp.lt.u32.totalorder %s853_s14, %s906_s5 }
 0x218   : > { %p631_p1 = scmp.lt.u32.totalorder %s629_s10, %s625_s8  ;;  %p633_p6 = scmp.lt.u32.totalorder %s625_s8, %s853_s14 }
 0x219   : > { %p627_p5 = pnand %p626_p4, %p913_p11 }
 0x21a   : > { %p632_p3 = por %p631_p1, %p630_p9 }
 0x21b   : > { %p628_p7 = pneg %p627_p5 }
 0x21c   : > { %p634_p12 = por %p633_p6, %p632_p3 }
 0x21e   : > { %p635_p13 = pnand %p634_p12, %p628_p7 }
 0x220   : > { %638 = shalt.err (!%p635_p13)
}
 0x221   : > { %s685_s17 = smov 128   ;;  %s686_s28 = smov 8  }
 0x222   : > { %521 = dma.vmem_to_hbm [thread:$0]  (%p913_p11), %s855_s26, 256, %s853_s14, %s392_s22, %s685_s17, %s685_s17, %s686_s28  }
 0x223 PF: > { %s420_s12 = sand.u32 1, %s665_s18   ;;  %p914_p8 = scmp.ne.s32.totalorder %s911_s6, 0 }
 0x224   : > { %p915_p10 = scmp.ge.s32.totalorder %s677_s21, 2  ;;  %s421_s25 = scalar_lea.sflag [#allocation4], %s420_s12 }
 0x226   : > { %p528_p0 = pnand %p915_p10, %p914_p8 }
 0x228   : > { %660 = dma.done.wait (!%p528_p0), %s421_s25, 256  }
 0x229   : > { %662 = vsyncadd (!%p528_p0), %s421_s25, 4294967040  ;;  %p18_p2 = scmp.ge.s32.totalorder %s742_s24, 4   ;;  %s916_s18 = smov %s669_s19 }
 0x22a   : > { %s917_s19 = smov %s673_s20  ;;  %s918_s20 = smov %s754_s27 }
 0x22b   : > { %s919_s21 = smov %s742_s24  ;;  %20 = sbr.rel (!%p18_p2) target bundleno = 5 (0x5), region = 85 }
 0x232   :  { %426 = vsyncpa [#allocation3], 1 }
 0x233   :  { %428 = vsyncpa [#allocation3 + $0x1], 1 }
 0x234   :  { %429 = vsyncpa [#allocation4], 1 }
 0x235   :  { %431 = vsyncpa [#allocation4 + $0x1], 1 }

</bundles_post_ra>
